<compile_context>
chip_gen: v6e
topology: v6e:2x2x1
jax: 0.10.0
libtpu: 0.0.40
codegen_flags: <defaults>
</compile_context>

<pallas_src>
import functools

import jax
import jax.numpy as jnp
import numpy as np
from jax import lax
from jax.experimental import pallas as pl
from jax.experimental.pallas import tpu as pltpu


# ----------------------------------------------------------------------------
# Fused forward kernel: conv stack + flatten + single-step LSTM + heads.
# ----------------------------------------------------------------------------
def _fused_forward_kernel(*refs, B, geoms, hidden):
    n_l = len(geoms)
    xe_ref, xo_ref = refs[0], refs[1]                       # even / odd input rows
    conv_refs = refs[2:2 + 2 * n_l]                         # (Wb, bias_flat) per layer
    wg_ref, bg_ref, wh_ref, bh_ref = refs[2 + 2 * n_l:6 + 2 * n_l]
    out_ref = refs[6 + 2 * n_l]
    a_refs = refs[7 + 2 * n_l:7 + 3 * n_l]                  # conv operand scratches
    fs_ref = refs[7 + 3 * n_l]                              # (B, F) feature scratch

    y = None
    for l, (S_in, S_out, H_in, H_out) in enumerate(geoms):
        a = a_refs[l]                                       # (H_out*B, 3*S_in) bf16
        if l == 0:
            # Input rows arrive pre-split by parity, so every tap block is one
            # contiguous store (tap t uses input row 2*oh + t - 1).
            a[0:B, 0:S_in] = jnp.zeros((B, S_in), a.dtype)              # pad row -1
            a[B:H_out * B, 0:S_in] = xo_ref[0:(H_out - 1) * B, :]       # t=0: odd, shifted
            a[:, S_in:2 * S_in] = xe_ref[...]                           # t=1: even rows
            a[:, 2 * S_in:3 * S_in] = xo_ref[...]                       # t=2: odd rows
        else:
            for oh in range(H_out):
                r0 = oh * B
                for t in range(3):
                    h = 2 * oh + t - 1
                    c0, c1 = t * S_in, (t + 1) * S_in
                    if 0 <= h < H_in:
                        a[r0:r0 + B, c0:c1] = y[h * B:(h + 1) * B, :]
                    else:
                        a[r0:r0 + B, c0:c1] = jnp.zeros((B, S_in), a.dtype)
        wb = conv_refs[2 * l][...]                          # (3*S_in, S_out) bf16
        bf = conv_refs[2 * l + 1][...]                      # (1, S_out) f32
        yf = jnp.maximum(
            jnp.dot(a[...], wb, preferred_element_type=jnp.float32) + bf, 0.0)
        y = yf.astype(jnp.bfloat16)                         # rows (oh, b), cols (ow, c)

    # Flatten (oh, b) rows -> lane-dense (B, F) feature slab.
    S_last, H_last = geoms[-1][1], geoms[-1][3]
    for oh in range(H_last):
        fs_ref[:, oh * S_last:(oh + 1) * S_last] = y[oh * B:(oh + 1) * B, :]
    feat = fs_ref[...]                                      # (B, F) bf16

    # Single LSTM step from zero state; gates packed as [i | g | o] (f*c0 == 0).
    gates = jnp.dot(feat, wg_ref[...], preferred_element_type=jnp.float32) + bg_ref[...]
    i_g = jax.nn.sigmoid(gates[:, 0:hidden])
    g_g = jnp.tanh(gates[:, hidden:2 * hidden])
    o_g = jax.nn.sigmoid(gates[:, 2 * hidden:3 * hidden])
    h = o_g * jnp.tanh(i_g * g_g)                           # c = i*g since c0 == 0

    # Fused actor + critic heads -> one lane-dense (B, 128) output.
    out_ref[...] = (jnp.dot(h.astype(jnp.bfloat16), wh_ref[...],
                            preferred_element_type=jnp.float32)
                    + bh_ref[...]).astype(out_ref.dtype)


# ----------------------------------------------------------------------------
# Full forward pass (equivalent of CNNLSTMActorCritic.forward)
# ----------------------------------------------------------------------------
def cnn_lstm_actor_critic_forward(obs, prepped, *, cfg):
    B, C, H, W = obs.shape
    geoms = cfg["geoms"]
    hidden = cfg["hidden"]
    A = cfg["act_dim"]
    F = cfg["feat_dim"]
    Gp = prepped["Wg"].shape[1]
    Np = prepped["Wh"].shape[1]

    # Only O(1x volume) input plumbing stays in XLA: NCHW -> per-row (w,c)
    # slabs + even/odd row split of obs (everything else is inside the kernel).
    x = jnp.transpose(obs, (2, 0, 3, 1)).reshape(H, B, W * C).astype(jnp.bfloat16)
    xe = x[0::2].reshape((H // 2) * B, W * C)
    xo = x[1::2].reshape((H // 2) * B, W * C)

    inputs = [xe, xo]
    for (Wb, bf) in prepped["conv"]:
        inputs += [Wb, bf]
    inputs += [prepped["Wg"], prepped["bg"], prepped["Wh"], prepped["bh"]]

    scratch = [pltpu.VMEM((g[3] * B, 3 * g[0]), jnp.bfloat16) for g in geoms]
    scratch.append(pltpu.VMEM((B, F), jnp.bfloat16))

    flops = 0
    for (S_in, S_out, _, H_out) in geoms:
        flops += 2 * (H_out * B) * (3 * S_in) * S_out
    flops += 2 * B * F * Gp + 2 * B * hidden * Np
    bytes_accessed = sum(int(np.prod(a.shape)) * a.dtype.itemsize for a in inputs)
    bytes_accessed += B * Np * 4
    transcendentals = 4 * B * hidden

    kern = functools.partial(_fused_forward_kernel, B=B, geoms=geoms, hidden=hidden)
    out = pl.pallas_call(
        kern,
        out_shape=jax.ShapeDtypeStruct((B, Np), jnp.float32),
        in_specs=[pl.BlockSpec(a.shape, lambda: (0, 0)) for a in inputs],
        out_specs=pl.BlockSpec((B, Np), lambda: (0, 0)),
        scratch_shapes=scratch,
        cost_estimate=pl.CostEstimate(flops=flops,
                                      transcendentals=transcendentals,
                                      bytes_accessed=bytes_accessed),
    )(*inputs)
    return out[:, :A], out[:, A:A + 1]


# ----------------------------------------------------------------------------
# One-time parameter preparation: banded conv weights, folded biases,
# permuted / packed LSTM gate weights, fused heads (all pre-cast to bf16).
# ----------------------------------------------------------------------------
def prepare_params(params, obs_chw):
    C0, H0, W0 = obs_chw
    geoms, conv_prepped = [], []
    c_in, h_in, w_in = C0, H0, W0
    for (wgt, bias, stride, pad) in params["conv"]:
        c_out, ci, kh, kw = wgt.shape
        assert ci == c_in
        assert (kh, kw, stride, pad) == (3, 3, 2, 1), "specialized to k=3, s=2, p=1"
        assert h_in % 2 == 0 and w_in % 2 == 0
        h_out, w_out = h_in // 2, w_in // 2
        S_in, S_out = w_in * c_in, w_out * c_out
        wnp = np.asarray(wgt, np.float32)                   # (c_out, c_in, 3, 3)
        Wb = np.zeros((3 * S_in, S_out), np.float32)
        for t in range(3):                                  # H-tap
            for ow in range(w_out):
                for j in range(3):                          # W-tap (W-padding folded in)
                    wi = 2 * ow + j - 1
                    if 0 <= wi < w_in:
                        Wb[t * S_in + wi * c_in:t * S_in + (wi + 1) * c_in,
                           ow * c_out:(ow + 1) * c_out] = wnp[:, :, t, j].T
        bflat = np.tile(np.asarray(bias, np.float32), w_out).reshape(1, S_out)
        conv_prepped.append((jnp.asarray(Wb, jnp.bfloat16),
                             jnp.asarray(bflat, jnp.float32)))
        geoms.append((S_in, S_out, h_in, h_out))
        c_in, h_in, w_in = c_out, h_out, w_out

    F = c_in * h_in * w_in
    Hd = params["w_act"].shape[1]                           # LSTM hidden size
    A = params["w_act"].shape[0]                            # action dim
    Gp = 128 * int(np.ceil(3 * Hd / 128))                   # packed gate width
    Np = 128 * int(np.ceil((A + 1) / 128))                  # fused head output width

    # Kernel feature order is (oh, ow, c); PyTorch flattens (c, oh, ow).
    oh_i, ow_i, co_i = np.meshgrid(np.arange(h_in), np.arange(w_in),
                                   np.arange(c_in), indexing="ij")
    perm = (co_i * (h_in * w_in) + oh_i * w_in + ow_i).reshape(-1)
    w_ih = np.asarray(params["w_ih"], np.float32)[:, perm]  # (4*Hd, F)
    b_sum = np.asarray(params["b_ih"], np.float32) + np.asarray(params["b_hh"], np.float32)

    Wg = np.zeros((F, Gp), np.float32)
    bg = np.zeros((1, Gp), np.float32)
    for slot, gate in enumerate((0, 2, 3)):                 # i, g, o (f*c0 == 0 dropped)
        Wg[:, slot * Hd:(slot + 1) * Hd] = w_ih[gate * Hd:(gate + 1) * Hd, :].T
        bg[0, slot * Hd:(slot + 1) * Hd] = b_sum[gate * Hd:(gate + 1) * Hd]

    Wh = np.zeros((Hd, Np), np.float32)                     # actor cols [0,A), critic col A
    bh = np.zeros((1, Np), np.float32)
    Wh[:, :A] = np.asarray(params["w_act"], np.float32).T
    Wh[:, A] = np.asarray(params["w_val"], np.float32)[0]
    bh[0, :A] = np.asarray(params["b_act"], np.float32)
    bh[0, A] = np.asarray(params["b_val"], np.float32)[0]

    prepped = {
        "conv": conv_prepped,
        "Wg": jnp.asarray(Wg, jnp.bfloat16),
        "bg": jnp.asarray(bg, jnp.float32),
        "Wh": jnp.asarray(Wh, jnp.bfloat16),
        "bh": jnp.asarray(bh, jnp.float32),
    }
    cfg = {"geoms": tuple(geoms), "hidden": Hd, "act_dim": A, "feat_dim": F}
    return prepped, cfg


# ----------------------------------------------------------------------------
# Pure-JAX reference on the raw (PyTorch-layout) params.
# ----------------------------------------------------------------------------
def reference_forward(obs, params):
    x = obs
    for (w, b, stride, pad) in params["conv"]:
        x = lax.conv_general_dilated(
            x, w, window_strides=(stride, stride),
            padding=[(pad, pad), (pad, pad)],
            dimension_numbers=("NCHW", "OIHW", "NCHW"))
        x = jnp.maximum(x + b[None, :, None, None], 0.0)
    feat = x.reshape(x.shape[0], -1)
    gates = feat @ params["w_ih"].T + params["b_ih"] + params["b_hh"]
    H = params["w_ih"].shape[0] // 4
    i_g = jax.nn.sigmoid(gates[:, 0 * H:1 * H])
    g_g = jnp.tanh(gates[:, 2 * H:3 * H])
    o_g = jax.nn.sigmoid(gates[:, 3 * H:4 * H])
    h = o_g * jnp.tanh(i_g * g_g)
    act = h @ params["w_act"].T + params["b_act"]
    val = h @ params["w_val"].T + params["b_val"]
    return act, val


# ----------------------------------------------------------------------------
# Deterministic synthetic parameters (shapes follow the module's __init__)
# ----------------------------------------------------------------------------
def make_params(key, in_channels, out_channels, kernel_sizes, strides, padding,
                img_hw, hidden, act_dim):
    keys = jax.random.split(key, 16)
    conv = []
    c_prev = in_channels
    h, w = img_hw
    ki = 0
    for c_out, ks, st, pd in zip(out_channels, kernel_sizes, strides, padding):
        wgt = 0.1 * jax.random.normal(keys[ki], (c_out, c_prev, ks, ks),
                                      jnp.float32); ki += 1
        bias = 0.1 * jax.random.normal(keys[ki], (c_out,), jnp.float32); ki += 1
        conv.append((wgt, bias, st, pd))
        h = (h + 2 * pd - ks) // st + 1
        w = (w + 2 * pd - ks) // st + 1
        c_prev = c_out
    conv_flat = c_prev * h * w
    return {
        "conv": conv,
        "w_ih": 0.1 * jax.random.normal(keys[ki + 0], (4 * hidden, conv_flat), jnp.float32),
        "b_ih": 0.1 * jax.random.normal(keys[ki + 1], (4 * hidden,), jnp.float32),
        "b_hh": 0.1 * jax.random.normal(keys[ki + 2], (4 * hidden,), jnp.float32),
        "w_act": 0.1 * jax.random.normal(keys[ki + 3], (act_dim, hidden), jnp.float32),
        "b_act": 0.1 * jax.random.normal(keys[ki + 4], (act_dim,), jnp.float32),
        "w_val": 0.1 * jax.random.normal(keys[ki + 5], (1, hidden), jnp.float32),
        "b_val": 0.1 * jax.random.normal(keys[ki + 6], (1,), jnp.float32),
    }


if __name__ == "__main__":
    # Small config: obs (B=2, C=4, 16, 16); conv [8, 16] k=3 s=2 p=1;
    # LSTM hidden (features_out) = 32; discrete act_dim = 6.
    B, C, H, W = 2, 4, 16, 16
    hidden, act_dim = 32, 6

    key = jax.random.PRNGKey(0)
    k_obs, k_par = jax.random.split(key)
    obs = jax.random.normal(k_obs, (B, C, H, W), jnp.float32)
    params = make_params(k_par, C, [8, 16], [3, 3], [2, 2], [1, 1],
                         (H, W), hidden, act_dim)

    prepped, cfg = prepare_params(params, (C, H, W))
    fwd = jax.jit(functools.partial(cnn_lstm_actor_critic_forward, cfg=cfg))

    act, val = fwd(obs, prepped)
    act, val = jax.block_until_ready((act, val))

    # bf16 MXU operands / bf16 intermediates -> validate against the f32
    # reference with a bf16-level tolerance.
    act_ref, val_ref = reference_forward(obs, params)
    np.testing.assert_allclose(np.asarray(act), np.asarray(act_ref),
                               rtol=2e-2, atol=2e-2)
    np.testing.assert_allclose(np.asarray(val), np.asarray(val_ref),
                               rtol=2e-2, atol=2e-2)
    assert act.shape == (B, act_dim) and val.shape == (B, 1)

    print("KERNEL_OK")
</pallas_src>

<mosaic_0001>
module attributes {stable_mosaic.version = 11 : i64} {
  func.func @_fused_forward_kernel(%arg0: memref<16x64xbf16, #tpu.memory_space<vmem>>, %arg1: memref<16x64xbf16, #tpu.memory_space<vmem>>, %arg2: memref<192x64xbf16, #tpu.memory_space<vmem>>, %arg3: memref<1x64xf32, #tpu.memory_space<vmem>>, %arg4: memref<192x64xbf16, #tpu.memory_space<vmem>>, %arg5: memref<1x64xf32, #tpu.memory_space<vmem>>, %arg6: memref<256x128xbf16, #tpu.memory_space<vmem>>, %arg7: memref<1x128xf32, #tpu.memory_space<vmem>>, %arg8: memref<32x128xbf16, #tpu.memory_space<vmem>>, %arg9: memref<1x128xf32, #tpu.memory_space<vmem>>, %arg10: memref<2x128xf32, #tpu.memory_space<vmem>>, %arg11: memref<16x192xbf16, #tpu.memory_space<vmem>>, %arg12: memref<8x192xbf16, #tpu.memory_space<vmem>>, %arg13: memref<2x256xbf16, #tpu.memory_space<vmem>>) attributes {dimension_semantics = [], scalar_prefetch = 0 : i64, scratch_operands = 3 : i64, tpu.core_type = #tpu.core_type<tc>} {
    %cst = arith.constant 0.000000e+00 : bf16
    %0 = vector.broadcast %cst : bf16 to vector<2x64xbf16>
    %c0 = arith.constant 0 : index
    %c0_0 = arith.constant 0 : index
    %1 = vector.load %arg11[%c0, %c0_0] : memref<16x192xbf16, #tpu.memory_space<vmem>>, vector<2x64xbf16>
    tpu.vector_store %arg11[%c0, %c0_0], %0 {strides = array<i32>} : memref<16x192xbf16, #tpu.memory_space<vmem>>, vector<2x64xbf16>,
    %c0_1 = arith.constant 0 : index
    %c0_2 = arith.constant 0 : index
    %2 = vector.load %arg1[%c0_1, %c0_2] : memref<16x64xbf16, #tpu.memory_space<vmem>>, vector<14x64xbf16>
    %c2 = arith.constant 2 : index
    %c0_3 = arith.constant 0 : index
    %3 = vector.load %arg11[%c2, %c0_3] : memref<16x192xbf16, #tpu.memory_space<vmem>>, vector<14x64xbf16>
    tpu.vector_store %arg11[%c2, %c0_3], %2 {strides = array<i32>} : memref<16x192xbf16, #tpu.memory_space<vmem>>, vector<14x64xbf16>,
    %c0_4 = arith.constant 0 : index
    %c0_5 = arith.constant 0 : index
    %4 = vector.load %arg0[%c0_4, %c0_5] : memref<16x64xbf16, #tpu.memory_space<vmem>>, vector<16x64xbf16>
    %c0_6 = arith.constant 0 : index
    %c64 = arith.constant 64 : index
    %5 = vector.load %arg11[%c0_6, %c64] : memref<16x192xbf16, #tpu.memory_space<vmem>>, vector<16x64xbf16>
    tpu.vector_store %arg11[%c0_6, %c64], %4 {strides = array<i32>} : memref<16x192xbf16, #tpu.memory_space<vmem>>, vector<16x64xbf16>,
    %c0_7 = arith.constant 0 : index
    %c0_8 = arith.constant 0 : index
    %6 = vector.load %arg1[%c0_7, %c0_8] : memref<16x64xbf16, #tpu.memory_space<vmem>>, vector<16x64xbf16>
    %c0_9 = arith.constant 0 : index
    %c128 = arith.constant 128 : index
    %7 = vector.load %arg11[%c0_9, %c128] : memref<16x192xbf16, #tpu.memory_space<vmem>>, vector<16x64xbf16>
    tpu.vector_store %arg11[%c0_9, %c128], %6 {strides = array<i32>} : memref<16x192xbf16, #tpu.memory_space<vmem>>, vector<16x64xbf16>,
    %c0_10 = arith.constant 0 : index
    %c0_11 = arith.constant 0 : index
    %8 = vector.load %arg2[%c0_10, %c0_11] : memref<192x64xbf16, #tpu.memory_space<vmem>>, vector<192x64xbf16>
    %c0_12 = arith.constant 0 : index
    %c0_13 = arith.constant 0 : index
    %9 = vector.load %arg3[%c0_12, %c0_13] : memref<1x64xf32, #tpu.memory_space<vmem>>, vector<1x64xf32>
    %c0_14 = arith.constant 0 : index
    %c0_15 = arith.constant 0 : index
    %10 = vector.load %arg11[%c0_14, %c0_15] : memref<16x192xbf16, #tpu.memory_space<vmem>>, vector<16x192xbf16>
    %cst_16 = arith.constant dense<0.000000e+00> : vector<16x64xf32>
    %11 = tpu.matmul %10, %8, %cst_16 {dimension_numbers = #tpu.dot_dimension_numbers<[1], [0], [0], [1], [0, 0, 1, 1], [], []>} : vector<16x192xbf16>, vector<192x64xbf16>, vector<16x64xf32> -> vector<16x64xf32>
    %12 = vector.broadcast %9 : vector<1x64xf32> to vector<16x64xf32>
    %13 = arith.addf %11, %12 : vector<16x64xf32>
    %cst_17 = arith.constant 0.000000e+00 : f32
    %14 = vector.broadcast %cst_17 : f32 to vector<16x64xf32>
    %15 = arith.maximumf %13, %14 : vector<16x64xf32>
    %16 = arith.truncf %15 : vector<16x64xf32> to vector<16x64xbf16>
    %cst_18 = arith.constant 0.000000e+00 : bf16
    %17 = vector.broadcast %cst_18 : bf16 to vector<2x64xbf16>
    %c0_19 = arith.constant 0 : index
    %c0_20 = arith.constant 0 : index
    %18 = vector.load %arg12[%c0_19, %c0_20] : memref<8x192xbf16, #tpu.memory_space<vmem>>, vector<2x64xbf16>
    tpu.vector_store %arg12[%c0_19, %c0_20], %17 {strides = array<i32>} : memref<8x192xbf16, #tpu.memory_space<vmem>>, vector<2x64xbf16>,
    %19 = vector.extract_strided_slice %16 {offsets = [0, 0], sizes = [2, 64], strides = [1, 1]} : vector<16x64xbf16> to vector<2x64xbf16>
    %c0_21 = arith.constant 0 : index
    %c64_22 = arith.constant 64 : index
    %20 = vector.load %arg12[%c0_21, %c64_22] : memref<8x192xbf16, #tpu.memory_space<vmem>>, vector<2x64xbf16>
    tpu.vector_store %arg12[%c0_21, %c64_22], %19 {strides = array<i32>} : memref<8x192xbf16, #tpu.memory_space<vmem>>, vector<2x64xbf16>,
    %21 = vector.extract_strided_slice %16 {offsets = [2, 0], sizes = [2, 64], strides = [1, 1]} : vector<16x64xbf16> to vector<2x64xbf16>
    %c0_23 = arith.constant 0 : index
    %c128_24 = arith.constant 128 : index
    %22 = vector.load %arg12[%c0_23, %c128_24] : memref<8x192xbf16, #tpu.memory_space<vmem>>, vector<2x64xbf16>
    tpu.vector_store %arg12[%c0_23, %c128_24], %21 {strides = array<i32>} : memref<8x192xbf16, #tpu.memory_space<vmem>>, vector<2x64xbf16>,
    %23 = vector.extract_strided_slice %16 {offsets = [2, 0], sizes = [2, 64], strides = [1, 1]} : vector<16x64xbf16> to vector<2x64xbf16>
    %c2_25 = arith.constant 2 : index
    %c0_26 = arith.constant 0 : index
    %24 = vector.load %arg12[%c2_25, %c0_26] : memref<8x192xbf16, #tpu.memory_space<vmem>>, vector<2x64xbf16>
    tpu.vector_store %arg12[%c2_25, %c0_26], %23 {strides = array<i32>} : memref<8x192xbf16, #tpu.memory_space<vmem>>, vector<2x64xbf16>,
    %25 = vector.extract_strided_slice %16 {offsets = [4, 0], sizes = [2, 64], strides = [1, 1]} : vector<16x64xbf16> to vector<2x64xbf16>
    %c2_27 = arith.constant 2 : index
    %c64_28 = arith.constant 64 : index
    %26 = vector.load %arg12[%c2_27, %c64_28] : memref<8x192xbf16, #tpu.memory_space<vmem>>, vector<2x64xbf16>
    tpu.vector_store %arg12[%c2_27, %c64_28], %25 {strides = array<i32>} : memref<8x192xbf16, #tpu.memory_space<vmem>>, vector<2x64xbf16>,
    %27 = vector.extract_strided_slice %16 {offsets = [6, 0], sizes = [2, 64], strides = [1, 1]} : vector<16x64xbf16> to vector<2x64xbf16>
    %c2_29 = arith.constant 2 : index
    %c128_30 = arith.constant 128 : index
    %28 = vector.load %arg12[%c2_29, %c128_30] : memref<8x192xbf16, #tpu.memory_space<vmem>>, vector<2x64xbf16>
    tpu.vector_store %arg12[%c2_29, %c128_30], %27 {strides = array<i32>} : memref<8x192xbf16, #tpu.memory_space<vmem>>, vector<2x64xbf16>,
    %29 = vector.extract_strided_slice %16 {offsets = [6, 0], sizes = [2, 64], strides = [1, 1]} : vector<16x64xbf16> to vector<2x64xbf16>
    %c4 = arith.constant 4 : index
    %c0_31 = arith.constant 0 : index
    %30 = vector.load %arg12[%c4, %c0_31] : memref<8x192xbf16, #tpu.memory_space<vmem>>, vector<2x64xbf16>
    tpu.vector_store %arg12[%c4, %c0_31], %29 {strides = array<i32>} : memref<8x192xbf16, #tpu.memory_space<vmem>>, vector<2x64xbf16>,
    %31 = vector.extract_strided_slice %16 {offsets = [8, 0], sizes = [2, 64], strides = [1, 1]} : vector<16x64xbf16> to vector<2x64xbf16>
    %c4_32 = arith.constant 4 : index
    %c64_33 = arith.constant 64 : index
    %32 = vector.load %arg12[%c4_32, %c64_33] : memref<8x192xbf16, #tpu.memory_space<vmem>>, vector<2x64xbf16>
    tpu.vector_store %arg12[%c4_32, %c64_33], %31 {strides = array<i32>} : memref<8x192xbf16, #tpu.memory_space<vmem>>, vector<2x64xbf16>,
    %33 = vector.extract_strided_slice %16 {offsets = [10, 0], sizes = [2, 64], strides = [1, 1]} : vector<16x64xbf16> to vector<2x64xbf16>
    %c4_34 = arith.constant 4 : index
    %c128_35 = arith.constant 128 : index
    %34 = vector.load %arg12[%c4_34, %c128_35] : memref<8x192xbf16, #tpu.memory_space<vmem>>, vector<2x64xbf16>
    tpu.vector_store %arg12[%c4_34, %c128_35], %33 {strides = array<i32>} : memref<8x192xbf16, #tpu.memory_space<vmem>>, vector<2x64xbf16>,
    %35 = vector.extract_strided_slice %16 {offsets = [10, 0], sizes = [2, 64], strides = [1, 1]} : vector<16x64xbf16> to vector<2x64xbf16>
    %c6 = arith.constant 6 : index
    %c0_36 = arith.constant 0 : index
    %36 = vector.load %arg12[%c6, %c0_36] : memref<8x192xbf16, #tpu.memory_space<vmem>>, vector<2x64xbf16>
    tpu.vector_store %arg12[%c6, %c0_36], %35 {strides = array<i32>} : memref<8x192xbf16, #tpu.memory_space<vmem>>, vector<2x64xbf16>,
    %37 = vector.extract_strided_slice %16 {offsets = [12, 0], sizes = [2, 64], strides = [1, 1]} : vector<16x64xbf16> to vector<2x64xbf16>
    %c6_37 = arith.constant 6 : index
    %c64_38 = arith.constant 64 : index
    %38 = vector.load %arg12[%c6_37, %c64_38] : memref<8x192xbf16, #tpu.memory_space<vmem>>, vector<2x64xbf16>
    tpu.vector_store %arg12[%c6_37, %c64_38], %37 {strides = array<i32>} : memref<8x192xbf16, #tpu.memory_space<vmem>>, vector<2x64xbf16>,
    %39 = vector.extract_strided_slice %16 {offsets = [14, 0], sizes = [2, 64], strides = [1, 1]} : vector<16x64xbf16> to vector<2x64xbf16>
    %c6_39 = arith.constant 6 : index
    %c128_40 = arith.constant 128 : index
    %40 = vector.load %arg12[%c6_39, %c128_40] : memref<8x192xbf16, #tpu.memory_space<vmem>>, vector<2x64xbf16>
    tpu.vector_store %arg12[%c6_39, %c128_40], %39 {strides = array<i32>} : memref<8x192xbf16, #tpu.memory_space<vmem>>, vector<2x64xbf16>,
    %c0_41 = arith.constant 0 : index
    %c0_42 = arith.constant 0 : index
    %41 = vector.load %arg4[%c0_41, %c0_42] : memref<192x64xbf16, #tpu.memory_space<vmem>>, vector<192x64xbf16>
    %c0_43 = arith.constant 0 : index
    %c0_44 = arith.constant 0 : index
    %42 = vector.load %arg5[%c0_43, %c0_44] : memref<1x64xf32, #tpu.memory_space<vmem>>, vector<1x64xf32>
    %c0_45 = arith.constant 0 : index
    %c0_46 = arith.constant 0 : index
    %43 = vector.load %arg12[%c0_45, %c0_46] : memref<8x192xbf16, #tpu.memory_space<vmem>>, vector<8x192xbf16>
    %cst_47 = arith.constant dense<0.000000e+00> : vector<8x64xf32>
    %44 = tpu.matmul %43, %41, %cst_47 {dimension_numbers = #tpu.dot_dimension_numbers<[1], [0], [0], [1], [0, 0, 1, 1], [], []>} : vector<8x192xbf16>, vector<192x64xbf16>, vector<8x64xf32> -> vector<8x64xf32>
    %45 = vector.broadcast %42 : vector<1x64xf32> to vector<8x64xf32>
    %46 = arith.addf %44, %45 : vector<8x64xf32>
    %cst_48 = arith.constant 0.000000e+00 : f32
    %47 = vector.broadcast %cst_48 : f32 to vector<8x64xf32>
    %48 = arith.maximumf %46, %47 : vector<8x64xf32>
    %49 = arith.truncf %48 : vector<8x64xf32> to vector<8x64xbf16>
    %50 = vector.extract_strided_slice %49 {offsets = [0, 0], sizes = [2, 64], strides = [1, 1]} : vector<8x64xbf16> to vector<2x64xbf16>
    %c0_49 = arith.constant 0 : index
    %c0_50 = arith.constant 0 : index
    %51 = vector.load %arg13[%c0_49, %c0_50] : memref<2x256xbf16, #tpu.memory_space<vmem>>, vector<2x64xbf16>
    tpu.vector_store %arg13[%c0_49, %c0_50], %50 {strides = array<i32>} : memref<2x256xbf16, #tpu.memory_space<vmem>>, vector<2x64xbf16>,
    %52 = vector.extract_strided_slice %49 {offsets = [2, 0], sizes = [2, 64], strides = [1, 1]} : vector<8x64xbf16> to vector<2x64xbf16>
    %c0_51 = arith.constant 0 : index
    %c64_52 = arith.constant 64 : index
    %53 = vector.load %arg13[%c0_51, %c64_52] : memref<2x256xbf16, #tpu.memory_space<vmem>>, vector<2x64xbf16>
    tpu.vector_store %arg13[%c0_51, %c64_52], %52 {strides = array<i32>} : memref<2x256xbf16, #tpu.memory_space<vmem>>, vector<2x64xbf16>,
    %54 = vector.extract_strided_slice %49 {offsets = [4, 0], sizes = [2, 64], strides = [1, 1]} : vector<8x64xbf16> to vector<2x64xbf16>
    %c0_53 = arith.constant 0 : index
    %c128_54 = arith.constant 128 : index
    %55 = vector.load %arg13[%c0_53, %c128_54] : memref<2x256xbf16, #tpu.memory_space<vmem>>, vector<2x64xbf16>
    tpu.vector_store %arg13[%c0_53, %c128_54], %54 {strides = array<i32>} : memref<2x256xbf16, #tpu.memory_space<vmem>>, vector<2x64xbf16>,
    %56 = vector.extract_strided_slice %49 {offsets = [6, 0], sizes = [2, 64], strides = [1, 1]} : vector<8x64xbf16> to vector<2x64xbf16>
    %c0_55 = arith.constant 0 : index
    %c192 = arith.constant 192 : index
    %57 = vector.load %arg13[%c0_55, %c192] : memref<2x256xbf16, #tpu.memory_space<vmem>>, vector<2x64xbf16>
    tpu.vector_store %arg13[%c0_55, %c192], %56 {strides = array<i32>} : memref<2x256xbf16, #tpu.memory_space<vmem>>, vector<2x64xbf16>,
    %c0_56 = arith.constant 0 : index
    %c0_57 = arith.constant 0 : index
    %58 = vector.load %arg13[%c0_56, %c0_57] : memref<2x256xbf16, #tpu.memory_space<vmem>>, vector<2x256xbf16>
    %c0_58 = arith.constant 0 : index
    %c0_59 = arith.constant 0 : index
    %59 = vector.load %arg6[%c0_58, %c0_59] : memref<256x128xbf16, #tpu.memory_space<vmem>>, vector<256x128xbf16>
    %cst_60 = arith.constant dense<0.000000e+00> : vector<2x128xf32>
    %60 = tpu.matmul %58, %59, %cst_60 {dimension_numbers = #tpu.dot_dimension_numbers<[1], [0], [0], [1], [0, 0, 1, 1], [], []>} : vector<2x256xbf16>, vector<256x128xbf16>, vector<2x128xf32> -> vector<2x128xf32>
    %c0_61 = arith.constant 0 : index
    %c0_62 = arith.constant 0 : index
    %61 = vector.load %arg7[%c0_61, %c0_62] : memref<1x128xf32, #tpu.memory_space<vmem>>, vector<1x128xf32>
    %62 = vector.broadcast %61 : vector<1x128xf32> to vector<2x128xf32>
    %63 = arith.addf %60, %62 : vector<2x128xf32>
    %64 = vector.extract_strided_slice %63 {offsets = [0, 0], sizes = [2, 32], strides = [1, 1]} : vector<2x128xf32> to vector<2x32xf32>
    %65 = arith.negf %64 : vector<2x32xf32>
    %66 = math.exp %65 : vector<2x32xf32>
    %cst_63 = arith.constant 1.000000e+00 : f32
    %67 = vector.broadcast %cst_63 : f32 to vector<2x32xf32>
    %68 = arith.addf %67, %66 : vector<2x32xf32>
    %69 = arith.divf %67, %68 : vector<2x32xf32>
    %70 = vector.extract_strided_slice %63 {offsets = [0, 32], sizes = [2, 32], strides = [1, 1]} : vector<2x128xf32> to vector<2x32xf32>
    %71 = math.tanh %70 : vector<2x32xf32>
    %72 = vector.extract_strided_slice %63 {offsets = [0, 64], sizes = [2, 32], strides = [1, 1]} : vector<2x128xf32> to vector<2x32xf32>
    %73 = arith.negf %72 : vector<2x32xf32>
    %74 = math.exp %73 : vector<2x32xf32>
    %cst_64 = arith.constant 1.000000e+00 : f32
    %75 = vector.broadcast %cst_64 : f32 to vector<2x32xf32>
    %76 = arith.addf %75, %74 : vector<2x32xf32>
    %77 = arith.divf %75, %76 : vector<2x32xf32>
    %78 = arith.mulf %69, %71 : vector<2x32xf32>
    %79 = math.tanh %78 : vector<2x32xf32>
    %80 = arith.mulf %77, %79 : vector<2x32xf32>
    %81 = arith.truncf %80 : vector<2x32xf32> to vector<2x32xbf16>
    %c0_65 = arith.constant 0 : index
    %c0_66 = arith.constant 0 : index
    %82 = vector.load %arg8[%c0_65, %c0_66] : memref<32x128xbf16, #tpu.memory_space<vmem>>, vector<32x128xbf16>
    %cst_67 = arith.constant dense<0.000000e+00> : vector<2x128xf32>
    %83 = tpu.matmul %81, %82, %cst_67 {dimension_numbers = #tpu.dot_dimension_numbers<[1], [0], [0], [1], [0, 0, 1, 1], [], []>} : vector<2x32xbf16>, vector<32x128xbf16>, vector<2x128xf32> -> vector<2x128xf32>
    %c0_68 = arith.constant 0 : index
    %c0_69 = arith.constant 0 : index
    %84 = vector.load %arg9[%c0_68, %c0_69] : memref<1x128xf32, #tpu.memory_space<vmem>>, vector<1x128xf32>
    %85 = vector.broadcast %84 : vector<1x128xf32> to vector<2x128xf32>
    %86 = arith.addf %83, %85 : vector<2x128xf32>
    %c0_70 = arith.constant 0 : index
    %c0_71 = arith.constant 0 : index
    %87 = vector.load %arg10[%c0_70, %c0_71] : memref<2x128xf32, #tpu.memory_space<vmem>>, vector<2x128xf32>
    tpu.vector_store %arg10[%c0_70, %c0_71], %86 {strides = array<i32>} : memref<2x128xf32, #tpu.memory_space<vmem>>, vector<2x128xf32>,
    return
  }
}

</mosaic_0001>

<bundles_post_ra>
// kernel: cnn_lstm_actor_critic_forward.1
= control target key start
LH: loop header
LB: loop body
LE: loop exit
PB: predicated region body
PF: predicated region fallthrough
CT: control target
= control target key end

     0   :  { %vm36_vm0 = vcmask 516096   ;;  %v921_v1 = vmov 0   ;;  %s922_s15 = smov 64   ;;  %vm42_vm1 = vcmask 1040384   ;;  %vm43_vm2 = vcmask 1044484   ;;  %s924_s19 = smov 96   ;;  %s1189_s0 = inlined_call_operand.vmem [shape: bf16[16,64], index: 0, kind: input, shape index: {}]   ;;  %s1190_s2 = inlined_call_operand.vmem [shape: bf16[192,64], index: 2, kind: input, shape index: {}]   ;;  %s1191_s1 = inlined_call_operand.vmem [shape: bf16[16,64], index: 1, kind: input, shape index: {}]   ;;  %s1192_s4 = inlined_call_operand.vmem [shape: bf16[192,64], index: 4, kind: input, shape index: {}]   ;;  %s1193_s3 = inlined_call_operand.vmem [shape: f32[1,64], index: 3, kind: input, shape index: {}]   ;;  %s1194_s6 = inlined_call_operand.vmem [shape: bf16[256,128], index: 6, kind: input, shape index: {}]   ;;  %s1195_s5 = inlined_call_operand.vmem [shape: f32[1,64], index: 5, kind: input, shape index: {}]   ;;  %s1196_s7 = inlined_call_operand.vmem [shape: f32[1,128], index: 7, kind: input, shape index: {}]   ;;  %s1197_s8 = inlined_call_operand.vmem [shape: bf16[32,128], index: 8, kind: input, shape index: {}]   ;;  %s1198_s9 = inlined_call_operand.vmem [shape: f32[1,128], index: 9, kind: input, shape index: {}]   ;;  %s1199_s10 = inlined_call_operand.vmem [shape: f32[2,128], index: 10, kind: output, shape index: {}]  }
   0x1   :  { %v55_v0 = vld [vmem:[%s1189_s0] sm:$0xf]  ;;  %190 = vmatprep.subr.bf16.mxu0 %v921_v1  ;;  %37 = vst.msk [vmem:[#allocation2] sm:$0x1] %vm36_vm0, %v921_v1  ;;  %234 = vst.msk [vmem:[#allocation3] sm:$0x1] %vm36_vm0, %v921_v1  ;;  %394 = vmatprep.subr.bf16.mxu1 %v921_v1 }
   0x2   :  { %59 = vrot.lane.b32.xlu0 %v55_v0, %s922_s15  ;;  %v866_v2 = vld [vmem:[%s1190_s2 + $0x38] sm:$0xff]   ;;  %v56_v3 = vld [vmem:[%s1189_s0 + $0x4] sm:$0xf]  ;;  %v867_v4 = vld [vmem:[%s1190_s2 + $0x30] sm:$0xff]   ;;  %vm51_vm3 = vcmask 519169   ;;  %vm53_vm4 = vcmask 519168  }
   0x3   :  { %191 = vmatpush1.bf16.msra.mxu0 %v866_v2  ;;  %v868_v5 = vld [vmem:[%s1190_s2 + $0x28] sm:$0xff]   ;;  %v38_v6 = vld [vmem:[%s1191_s1] sm:$0xf]  ;;  %v39_v9 = vld [vmem:[%s1191_s1 + $0x4] sm:$0x7]  ;;  %vm65_vm6 = vcmask 1043968  }
   0x4   :  { %192 = vmatprep.subr.bf16.mxu0 %v921_v1  ;;  %v869_v7 = vld [vmem:[%s1190_s2 + $0x20] sm:$0xff]   ;;  %v45_v8 = vrot.slane %v38_v6, 7  ;;  %vm44_vm5 = vmor %vm42_vm1, %vm43_vm2  ;;  %v47_v12 = vrot.slane %v39_v9, 7  ;;  %v870_v15 = vld [vmem:[%s1190_s2 + $0x18] sm:$0xff]   ;;  %vm186_vm7 = vcmask 523264   ;;  %vm247_vm8 = vcmask 517121  }
   0x5   :  { %v68_v10 = vld [vmem:[%s1191_s1] sm:$0xf]  ;;  %v69_v13 = vld [vmem:[%s1191_s1 + $0x4] sm:$0xf]  ;;  %v871_v16 = vld [vmem:[%s1190_s2 + $0x10] sm:$0xff]   ;;  %vm258_vm9 = vcmask 518146  }
   0x6   :  { %61 = vrot.lane.b32.xlu0 %v56_v3, %s922_s15  ;;  %52 = vst.msk [vmem:[#allocation2] sm:$0xe] %vm51_vm3, %v45_v8  ;;  %v46_v11 = vrot.slane %v45_v8, 4  ;;  %v872_v17 = vld [vmem:[%s1190_s2 + $0x8] sm:$0xff]   ;;  %v873_v18 = vld [vmem:[%s1190_s2] sm:$0xff]   ;;  %v874_v19 = vld [vmem:[%s1190_s2 + $0x58] sm:$0xff]  }
   0x7   :  { %193 = vmatpush1.bf16.msra.mxu0 %v867_v4  ;;  %70 = vst.msk [vmem:[#allocation2 + $0x4] sm:$0xf] %vm53_vm4, %v68_v10  ;;  %71 = vst.msk [vmem:[#allocation2 + $0xc] sm:$0xf] %vm53_vm4, %v69_v13  ;;  %v875_v20 = vld [vmem:[%s1190_s2 + $0x50] sm:$0xff]   ;;  %v876_v21 = vld [vmem:[%s1190_s2 + $0x48] sm:$0xff]   ;;  %v441_v10 = vlaneseq }
   0x8   :  { %194 = vmatprep.subr.bf16.mxu0 %v921_v1  ;;  %v48_v14 = vsel %vm44_vm5, %v46_v11, %v47_v12  ;;  %v877_v22 = vld [vmem:[%s1190_s2 + $0x40] sm:$0xff]   ;;  %v881_v27 = vld [vmem:[%s1192_s4 + $0x38] sm:$0xff]   ;;  %v882_v28 = vld [vmem:[%s1192_s4 + $0x30] sm:$0xff]   ;;  %vm272_vm10 = vcmask 519171   ;;  %vm241_vm11 = vcmask 1040896   ;;  %vm252_vm12 = vcmask 1041921  }
   0x9   :  { %54 = vst.msk [vmem:[#allocation2 + $0x8] sm:$0xf] %vm53_vm4, %v48_v14  ;;  %395 = vmatpush1.bf16.msra.mxu1 %v881_v27  ;;  %v883_v29 = vld [vmem:[%s1192_s4 + $0x28] sm:$0xff]   ;;  %v884_v30 = vld [vmem:[%s1192_s4 + $0x20] sm:$0xff]   ;;  %v885_v31 = vld [vmem:[%s1192_s4 + $0x18] sm:$0xff]   ;;  %vm266_vm13 = vcmask 1042946  }
   0xa   :  { %396 = vmatprep.subr.bf16.mxu1 %v921_v1  ;;  %v886_v32 = vld [vmem:[%s1192_s4 + $0x10] sm:$0xff]   ;;  %v887_v33 = vld [vmem:[%s1192_s4 + $0x8] sm:$0xff]   ;;  %v888_v34 = vld [vmem:[%s1192_s4] sm:$0xff]   ;;  %vm277_vm14 = vcmask 1043971   ;;  %v923_v8 = vmov 1966171168  }
   0xb   :  { %195 = vmatpush1.bf16.msra.mxu0 %v868_v5  ;;  %v889_v35 = vld [vmem:[%s1192_s4 + $0x58] sm:$0xff]   ;;  %v767_v36 = vld [vmem:[%s1193_s3] ss:$0 sm:$0xff]  ;;  %v890_v38 = vld [vmem:[%s1192_s4 + $0x50] sm:$0xff]   ;;  %v439_v9 = vunpack.c.l.s4 %v923_v8  ;;  %v442_v14 = vshrl.u32 %v441_v10, 7  ;;  %vm926_vm15 = vmmov 0  }
   0xc   :  { %196 = vmatprep.subr.bf16.mxu0 %v921_v1  ;;  %v891_v41 = vld [vmem:[%s1192_s4 + $0x48] sm:$0xff]   ;;  %v892_v47 = vld [vmem:[%s1192_s4 + $0x40] sm:$0xff]   ;;  %v895_v63 = vld [vmem:[%s1194_s6 + $0x78] sm:$0xff]  }
   0xd   :  { %397 = vmatpush1.bf16.msra.mxu1 %v882_v28  ;;  %v896_v0 = vld [vmem:[%s1194_s6 + $0x38] sm:$0xff]   ;;  %v898_v2 = vld [vmem:[%s1194_s6 + $0x30] sm:$0xff]   ;;  %v899_v3 = vld [vmem:[%s1194_s6 + $0x68] sm:$0xff]   ;;  %v440_v13 = vunpack.c.0.s8 %v439_v9 }
   0xe   :  { %v880_v26 = vld [vmem:[#allocation2 + $0x4] ss:$8 sps:$4 sm:$0xff]   ;;  %398 = vmatprep.subr.bf16.mxu1 %v921_v1  ;;  %v786_v11 = vld [vmem:[%s1195_s5] ss:$0 sm:$0xff]  ;;  %v904_v12 = vld [vmem:[%s1194_s6 + $0x18] sm:$0xff]  }
   0xf   :  { %197 = vmatpush1.bf16.msra.mxu0 %v869_v7  ;;  %782 = vmatprep.mubr.msk.bf16.mxu0 %vm186_vm7, %v880_v26  ;;  %v900_v4 = vld [vmem:[%s1194_s6 + $0x28] sm:$0xff]   ;;  %v901_v5 = vld [vmem:[%s1194_s6 + $0x60] sm:$0xff]   ;;  %v903_v7 = vld [vmem:[%s1194_s6 + $0x58] sm:$0xff]  }
  0x10   :  { %198 = vmatprep.subr.bf16.mxu0 %v921_v1  ;;  %v902_v6 = vld [vmem:[%s1194_s6 + $0x20] sm:$0xff]  }
  0x11   :  { %399 = vmatpush1.bf16.msra.mxu1 %v883_v29  ;;  %v909_v26 = vld [vmem:[%s1194_s6 + $0x40] sm:$0xff]  }
  0x12   :  { %400 = vmatprep.subr.bf16.mxu1 %v921_v1  ;;  %v910_v29 = vld [vmem:[%s1194_s6] sm:$0xff]  }
  0x13   :  { %199 = vmatpush1.bf16.msra.mxu0 %v870_v15 }
  0x14   :  { %200 = vmatprep.subr.bf16.mxu0 %v921_v1 }
  0x15   :  { %401 = vmatpush1.bf16.msra.mxu1 %v884_v30 }
  0x16   :  { %402 = vmatprep.subr.bf16.mxu1 %v921_v1 }
  0x17   :  { %201 = vmatpush1.bf16.msra.mxu0 %v871_v16 }
  0x18   :  { %202 = vmatprep.subr.bf16.mxu0 %v921_v1 }
  0x19   :  { %403 = vmatpush1.bf16.msra.mxu1 %v885_v31 }
  0x1a   :  { %404 = vmatprep.subr.bf16.mxu1 %v921_v1 }
  0x1b   :  { %203 = vmatpush1.bf16.msra.mxu0 %v872_v17  ;;  %v905_v17 = vld [vmem:[%s1194_s6 + $0x50] sm:$0xff]  }
  0x1c   :  { %204 = vmatprep.subr.bf16.mxu0 %v921_v1 }
  0x1d   :  { %405 = vmatpush1.bf16.msra.mxu1 %v886_v32 }
  0x1e   :  { %406 = vmatprep.subr.bf16.mxu1 %v921_v1 }
  0x1f   :  { %205 = vmatpush1.bf16.msra.mxu0 %v873_v18 }
  0x20   :  { %214 = vmatprep.subr.bf16.mxu0 %v921_v1 }
  0x21   :  { %407 = vmatpush1.bf16.msra.mxu1 %v887_v33 }
  0x22   :  { %408 = vmatprep.subr.bf16.mxu1 %v921_v1 }
  0x23   :  { %215 = vmatpush2.bf16.msra.mxu0 %v874_v19  ;;  %v906_v19 = vld [vmem:[%s1194_s6 + $0x10] sm:$0xff]  }
  0x24   :  { %216 = vmatprep.subr.bf16.mxu0 %v921_v1 }
  0x25   :  { %409 = vmatpush1.bf16.msra.mxu1 %v888_v34 }
  0x26   :  { %418 = vmatprep.subr.bf16.mxu1 %v921_v1 }
  0x27   :  { %217 = vmatpush2.bf16.msra.mxu0 %v875_v20  ;;  %v907_v20 = vld [vmem:[%s1194_s6 + $0x48] sm:$0xff]  }
  0x28   :  { %218 = vmatprep.subr.bf16.mxu0 %v921_v1 }
  0x29   :  { %419 = vmatpush2.bf16.msra.mxu1 %v889_v35 }
  0x2a   :  { %420 = vmatprep.subr.bf16.mxu1 %v921_v1 }
  0x2b   :  { %219 = vmatpush2.bf16.msra.mxu0 %v876_v21 }
  0x2c   :  { %220 = vmatprep.subr.bf16.mxu0 %v921_v1 }
  0x2d   :  { %421 = vmatpush2.bf16.msra.mxu1 %v890_v38 }
  0x2e   :  { %422 = vmatprep.subr.bf16.mxu1 %v921_v1 }
  0x2f   :  { %221 = vmatpush2.bf16.msra.mxu0 %v877_v22  ;;  %v443_v22 = vsub.s32 %v440_v13, %v442_v14 }
  0x30   :  { %827 = vmatprep.subr.bf16.mxu0 %v895_v63  ;;  %v821_v63 = vld [vmem:[%s1198_s9] ss:$0 sm:$0xff] }
  0x31   :  { %423 = vmatpush2.bf16.msra.mxu1 %v891_v41 }
  0x32   :  { %424 = vmatprep.subr.bf16.mxu1 %v921_v1  ;;  %v897_v1 = vld [vmem:[%s1194_s6 + $0x70] sm:$0xff]  }
  0x35   :  { %425 = vmatpush2.bf16.msra.mxu1 %v892_v47 }
  0x74   :  { %v60_v23 = vpop.permute.xlu0 %59 }
  0x75   :  { %66 = vst.msk [vmem:[#allocation2] sm:$0xf] %vm65_vm6, %v60_v23 }
  0x78   :  { %v62_v24 = vpop.permute.xlu0 %61 }
  0x79   :  { %67 = vst.msk [vmem:[#allocation2 + $0x8] sm:$0xf] %vm65_vm6, %v62_v24  ;;  %v908_v24 = vld [vmem:[%s1194_s6 + $0x8] sm:$0xff]  }
  0x80   :  { %v878_v25 = vld [vmem:[#allocation2] ss:$8 sps:$4 sm:$0xff]  }
  0x81   :  { %223 = vmatmul.mubr.bf16.vlgmr.msra.gmra.mxu0 %v878_v25 }
  0x82   :  { %828 = vmatpush3.bf16.msra.mxu0 %v896_v0 }
  0x83   :  { %829 = vmatprep.subr.bf16.mxu0 %v897_v1 }
  0x86   :  { %830 = vmatpush3.bf16.msra.mxu0 %v898_v2 }
  0x87   :  { %831 = vmatprep.subr.bf16.mxu0 %v899_v3 }
  0x8a   :  { %832 = vmatpush3.bf16.msra.mxu0 %v900_v4 }
  0x8b   :  { %833 = vmatprep.subr.bf16.mxu0 %v901_v5 }
  0x8e   :  { %834 = vmatpush3.bf16.msra.mxu0 %v902_v6 }
  0x8f   :  { %835 = vmatprep.subr.bf16.mxu0 %v903_v7 }
  0x92   :  { %836 = vmatpush3.bf16.msra.mxu0 %v904_v12 }
  0x93   :  { %837 = vmatprep.subr.bf16.mxu0 %v905_v17 }
  0x96   :  { %838 = vmatpush3.bf16.msra.mxu0 %v906_v19 }
  0x97   :  { %839 = vmatprep.subr.bf16.mxu0 %v907_v20 }
  0x9a   :  { %840 = vmatpush3.bf16.msra.mxu0 %v908_v24 }
  0x9b   :  { %841 = vmatprep.subr.bf16.mxu0 %v909_v26 }
  0x9e   :  { %842 = vmatpush3.bf16.msra.mxu0 %v910_v29 }
 0x141   :  { %v224_v37 = vpop.f32.mrf.mxu0 }
 0x142   :  { %v225_v39 = vadd.f32 %v767_v36, %v224_v37 }
 0x143   :  { %v226_v40 = vpop.f32.mrf.mxu0 }
 0x144   :  { %v231_v42 = vmax.f32 %v225_v39, 0.0 }
 0x145   :  { %v227_v43 = vpop.f32.mrf.mxu0 }
 0x146   :  { %v825_v44 = vpack.c.bf16 %v231_v42, %v231_v42  ;;  %v228_v45 = vadd.f32 %v767_v36, %v227_v43 }
 0x147   :  { %v229_v46 = vpop.f32.mrf.mxu0 }
 0x148   :  { %v784_v48 = vrot.slane %v825_v44, 10  ;;  %v232_v49 = vmax.f32 %v228_v45, 0.0  ;;  %238 = vrot.lane.b32.xlu1 %v825_v44, %s922_s15  ;;  %v243_v50 = vrot.slane %v825_v44, 5 }
 0x14a   :  { %v233_v51 = vpack.c.bf16 %v232_v49, %v231_v42  ;;  %v826_v52 = vpack.c.bf16 %v232_v49, %v232_v49  ;;  %v244_v53 = vrot.slane %v243_v50, 4  ;;  %257 = vst.msk [vmem:[#allocation3 + $0x4] sm:$0x2] %vm247_vm8, %v784_v48  ;;  %v802_v42 = vld [vmem:[%s1196_s7] ss:$0 sm:$0xff] }
 0x14c   :  { %249 = vrot.lane.b32.xlu1 %v244_v53, %s922_s15  ;;  %246 = vst.msk [vmem:[#allocation3 + $0x4] sm:$0x1] %vm36_vm0, %v244_v53  ;;  %v262_v54 = vrot.slane %v826_v52, 6  ;;  %v268_v55 = vrot.slane %v826_v52, 7 }
 0x14d   :  { %248 = vst.msk [vmem:[#allocation3] sm:$0x2] %vm247_vm8, %v233_v51 }
 0x14e   :  { %259 = vst.msk [vmem:[#allocation3] sm:$0x4] %vm258_vm9, %v244_v53  ;;  %263 = vrot.lane.b32.xlu0 %v262_v54, %s922_s15  ;;  %270 = vst.msk [vmem:[#allocation3 + $0x4] sm:$0x4] %vm258_vm9, %v268_v55 }
 0x14f   :  { %280 = vst.msk [vmem:[#allocation3 + $0x4] sm:$0x8] %vm272_vm10, %v826_v52  ;;  %273 = vst.msk [vmem:[#allocation3] sm:$0x8] %vm272_vm10, %v262_v54 }
 0x150   :  { %274 = vrot.lane.b32.xlu1 %v268_v55, %s922_s15  ;;  %v925_v55 = vmov 0.0  }
 0x151   :  { %852 = vmatprep.subr.bf16.mxu1 %v925_v55 }
 0x1ba   :  { %v239_v56 = vpop.permute.xlu1 %238 }
 0x1bb   :  { %242 = vst.msk [vmem:[#allocation3] sm:$0x1] %vm241_vm11, %v239_v56  ;;  %v911_v56 = vld [vmem:[%s1197_s8 + $0x8] sm:$0xff]  }
 0x1be   :  { %v250_v57 = vpop.permute.xlu1 %249 }
 0x1bf   :  { %253 = vst.msk [vmem:[#allocation3] sm:$0x2] %vm252_vm12, %v250_v57  ;;  %v912_v57 = vld [vmem:[%s1197_s8] sm:$0xff]  }
 0x1c0   :  { %v264_v58 = vpop.permute.xlu0 %263 }
 0x1c1   :  { %267 = vst.msk [vmem:[#allocation3] sm:$0x4] %vm266_vm13, %v264_v58 }
 0x1c2   :  { %v275_v59 = vpop.permute.xlu1 %274 }
 0x1c3   :  { %278 = vst.msk [vmem:[#allocation3] sm:$0x8] %vm277_vm14, %v275_v59 }
 0x1ca   :  { %v306_v60 = vld [vmem:[#allocation3] sm:$0xff] }
 0x1cb   :  { %v787_v61 = vcombine.low %v306_v60, %v306_v60  ;;  %v788_v62 = vcombine.high %v306_v60, %v306_v60 }
 0x1cd   :  { %801 = vmatprep.mubr.msk.bf16.mxu1 %vm186_vm7, %v788_v62 }
 0x1ce   :  { %427 = vmatmul.mubr.bf16.vlgmr.msra.gmra.mxu1 %v787_v61 }
 0x1cf   :  { %856 = vmatprep.mubr.msk.bf16.mxu1 %vm926_vm15, %v925_v55  ;;  %853 = vmatpush3.bf16.msra.mxu1 %v911_v56 }
 0x1d0   :  { %854 = vmatprep.subr.bf16.mxu1 %v925_v55 }
 0x1d3   :  { %855 = vmatpush3.bf16.msra.mxu1 %v912_v57 }
 0x28e   :  { %v428_v15 = vpop.f32.mrf.mxu1 }
 0x28f   :  { %v429_v16 = vadd.f32 %v786_v11, %v428_v15 }
 0x290   :  { %v430_v18 = vpop.f32.mrf.mxu1 }
 0x291   :  { %v434_v21 = vmax.f32 %v429_v16, 0.0 }
 0x292   :  { %v431_v23 = vpop.f32.mrf.mxu1 }
 0x293   :  { %v435_v25 = vpack.c.bf16 %v434_v21, %v434_v21 }
 0x294   :  { %v432_v27 = vpop.f32.mrf.mxu1 }
 0x295   :  { %436 = vst.msk [vmem:[#allocation4] sm:$0x1] %vm36_vm0, %v435_v25  ;;  %v444_v28 = vrot.slane %v435_v25, %v443_v22 }
 0x297   :  { %v445_v30 = vcombine.high %v444_v28, %v444_v28  ;;  %v452_v31 = vrot.slane %v444_v28, %v443_v22 }
 0x299   :  { %v459_v32 = vrot.slane %v445_v30, %v443_v22  ;;  %v464_v33 = vcombine.high %v452_v31, %v452_v31 }
 0x29b   :  { %460 = vrot.lane.b32.xlu0 %v459_v32, %s922_s15  ;;  %v467_v34 = vcombine.high %v459_v32, %v459_v32  ;;  %466 = vst.msk [vmem:[#allocation4 + $0x1] sm:$0x1] %vm36_vm0, %v464_v33  ;;  %vm718_vm0 = vcmask 261120  }
 0x29d   :  { %468 = vrot.lane.b32.xlu1 %v467_v34, %s922_s15 }
 0x30d   :  { %v461_v35 = vpop.permute.xlu0 %460 }
 0x30e   :  { %463 = vst.msk [vmem:[#allocation4] sm:$0x1] %vm241_vm11, %v461_v35 }
 0x30f   :  { %v469_v36 = vpop.permute.xlu1 %468 }
 0x310   :  { %471 = vst.msk [vmem:[#allocation4 + $0x1] sm:$0x1] %vm241_vm11, %v469_v36 }
 0x317   :  { %v803_v37 = vld.sshfl [vmem:[#allocation4] sm:$0x11 pattern:$0x75316420] }
 0x318   :  { %v520_v38 = vcombine.high %v803_v37, %v803_v37  ;;  %v527_v40 = vrot.slane %v803_v37, %v443_v22 }
 0x31a   :  { %v534_v39 = vrot.slane %v520_v38, %v443_v22 }
 0x31c   :  { %665 = vmatprep.mubr.bf16.mxu0 %v534_v39 }
 0x31d   :  { %666 = vmatmul.mubr.bf16.vlgmr.msra.gmra.mxu0 %v527_v40 }
 0x3dd   :  { %v843_v41 = vpop.f32.mrf.mxu0 }
 0x3df   :  { %v844_v43 = vpop.f32.mrf.mxu0 }
 0x3e0   :  { %v845_v44 = vadd.f32 %v844_v43, %v843_v41 }
 0x3e1   :  { %v846_v45 = vpop.f32.mrf.mxu0 }
 0x3e2   :  { %v668_v46 = vadd.f32 %v845_v44, %v802_v42 }
 0x3e3   :  { %v847_v47 = vpop.f32.mrf.mxu0 }
 0x3e4   :  { %913 = vtanh.f32 %v668_v46  ;;  %v820_v49 = vmul.f32 -1.442695, %v668_v46 }
 0x3e6   :  { %915 = vpow2.f32 %v820_v49 }
 0x3f1   :  { %v914_v48 = vpop.eup %913 }
 0x3f2   :  { %681 = vrot.lane.b32.xlu0 %v914_v48, %s924_s19 }
 0x3f3   :  { %v916_v50 = vpop.eup %915 }
 0x3f4   :  { %v676_v51 = vadd.f32 1.0, %v916_v50 }
 0x3f6   :  { %917 = vrcp.f32 %v676_v51 }
 0x403   :  { %v918_v52 = vpop.eup %917 }
 0x464   :  { %v682_v53 = vpop.permute.xlu0 %681 }
 0x465   :  { %v684_v54 = vmul.f32 %v918_v52, %v682_v53 }
 0x467   :  { %919 = vtanh.f32 %v684_v54 }
 0x474   :  { %v920_v58 = vpop.eup %919 }
 0x475   :  { %687 = vrot.lane.b32.xlu1 %v920_v58, %s922_s15 }
 0x4e7   :  { %v688_v59 = vpop.permute.xlu1 %687 }
 0x4e8   :  { %v690_v60 = vmul.f32 %v918_v52, %v688_v59 }
 0x4ea   :  { %v691_v61 = vpack.c.bf16 %v690_v60, %v690_v60 }
 0x4ec   :  { %704 = vrot.lane.b32.xlu0 %v691_v61, %s922_s15 }
 0x55e   :  { %v705_v62 = vpop.permute.xlu0 %704 }
 0x55f   :  { %857 = vmatmul.mubr.msk.bf16.vlgmr.msra.gmra.mxu1 %vm718_vm0, %v705_v62 }
 0x61f   :  { %v756_v0 = vpop.f32.mrf.mxu1 }
 0x620   :  { %v757_v1 = vadd.f32 %v821_v63, %v756_v0 }
 0x621   :  { %v858_v2 = vpop.f32.mrf.mxu1 }
 0x622   :  { %762 = vst [vmem:[%s1199_s10] sm:$0x3] %v757_v1 }
 0x623   :  { %v759_v3 = vpop.f32.mrf.mxu1 }
 0x625   :  { %v859_v4 = vpop.f32.mrf.mxu1 }

</bundles_post_ra>
